<compile_context>
chip_gen: v7x
topology: tpu7x:2x2x1
jax: 0.10.0
libtpu: 0.0.40
codegen_flags: <defaults>
</compile_context>

<pallas_src>
import jax
import jax.numpy as jnp
from jax import lax
from jax.experimental import pallas as pl
from jax.experimental.pallas import tpu as pltpu

K_HOPS = 3        # TAGConv default K
HIDDEN = 16       # both TAGConv layers output 16 channels
GRP = 8           # edge-gather unroll group size
NEG_BIG = -1e30   # bias for padded (fake) classes -> exp() == 0 in f32


def _round_up(a, b):
    return (a + b - 1) // b * b


def _tpu_vmem_capacity():
    try:
        return int(pltpu.get_tpu_info().vmem_capacity_bytes)
    except Exception:
        return 64 * 1024 * 1024      # conservative default (v7x-sized VMEM)


def _pick_tm(n_al, vmem_cap):
    """Largest node row tile whose double-buffered bf16 A row slab fits comfortably."""
    if n_al <= 512:
        return n_al
    budget = vmem_cap // 2
    for cand in (512, 256, 128):
        n_pad_est = _round_up(n_al, cand)
        if 2 * cand * n_pad_est * 2 <= budget:
            return cand
    # TODO(synk): for very large graphs add a column-tile grid axis on A_hat
    #             (bounds per-block VMEM independently of n_pad).
    return 128


# ----------------------------------------------------------------------------
# Node kernel: TAGConv x2 (fused hop-linears) + node-level classifier partials.
# Grid = (2*K_HOPS hop-steps [outer, sequential], node row tiles [inner, seq.]).
# ----------------------------------------------------------------------------
def _make_node_kernel(tm, fw1, fw2, a_resident):
    fws = (fw1, fw2)

    def node_kernel(a_ref, x_ref, w1_ref, b1_ref, w2_ref, b2_ref,
                    wcs_ref, wcd_ref, psrc_ref, pdst_ref, h1_scr, h2_scr):
        # CORRECTNESS: BOTH grid axes must execute sequentially ("arbitrary"):
        # every hop step reads scratch rows written by ALL row tiles of the
        # previous step.  Do not flip either axis to "parallel" without adding
        # cross-core barriers + shared scratch.
        # psrc/pdst use constant-index-map output blocks and are written only at
        # the final step (classic accumulator pattern); do not re-tile them by
        # row without also zero-initializing at step 0.
        s = pl.program_id(0)                  # (layer, hop) step   [outer]
        r = pl.program_id(1)                  # node row tile       [inner]
        rs = pl.multiple_of(r * tm, tm)
        rows = pl.ds(rs, tm)

        # (tm, n_pad) bf16 slab of A_hat for this row tile.
        a_blk = a_ref[rows, :] if a_resident else a_ref[...]

        w_refs = (w1_ref, w2_ref)
        b_refs = (b1_ref, b2_ref)
        scrs = (h1_scr, h2_scr)

        for layer in range(2):
            for hop in range(1, K_HOPS + 1):
                step = layer * K_HOPS + (hop - 1)

                @pl.when(s == step)
                def _(layer=layer, hop=hop, fw=fws[layer], scr=scrs[layer]):
                    if layer == 0 and hop == 1:
                        # Seed layer-1 hop-0 lane slice with x (already bf16).
                        scr[rows, 0:fw] = x_ref[rows, :]
                        prev = x_ref[...]                        # (n_pad, fw) bf16
                    else:
                        prev = scr[:, (hop - 1) * fw:hop * fw]   # (n_pad, fw) bf16
                    # Propagation: bf16 x bf16 MXU matmul, f32 accumulation.
                    h_new = jnp.dot(a_blk, prev,
                                    preferred_element_type=jnp.float32)  # (tm, fw)
                    # Cast once on write -> bf16 hop storage.
                    scr[rows, hop * fw:(hop + 1) * fw] = h_new.astype(jnp.bfloat16)

                    if hop == K_HOPS:
                        # Fused (K+1)-hop linear on the contiguous slab (no concat).
                        slab = scr[rows, :].astype(jnp.float32)  # (tm, (K+1)*fw)
                        y = jnp.dot(slab, w_refs[layer][...],
                                    preferred_element_type=jnp.float32)
                        y = jnp.maximum(y + b_refs[layer][...], 0.0)     # (tm, 16)
                        if layer == 0:
                            # dropout(training=False) == identity.  Seed layer-2
                            # hop-0 lane slice directly (no zero-pad concat).
                            h2_scr[rows, 0:HIDDEN] = y.astype(jnp.bfloat16)
                        else:
                            # Per-node classifier partials [tm, cp].
                            psrc_ref[rows, :] = jnp.dot(
                                y, wcs_ref[...],
                                preferred_element_type=jnp.float32)
                            pdst_ref[rows, :] = jnp.dot(
                                y, wcd_ref[...],
                                preferred_element_type=jnp.float32)

    return node_kernel


# ----------------------------------------------------------------------------
# Edge kernel: SMEM-index gather of node partials + bias + log_softmax in place.
# Grid = (edge tiles,) — "parallel".
# ----------------------------------------------------------------------------
def _make_edge_kernel(te, cp):
    def edge_kernel(src_ref, dst_ref, psrc_ref, pdst_ref, bc_ref, out_ref):
        e0 = pl.program_id(0) * te
        # Fully unrolled gather (static trip count) so the LLO can co-issue
        # loads and hide the SMEM-index -> vector-load latency.  Rows land
        # directly in out_ref (no accumulator scratch).
        # TODO(synk): assemble (GRP, cp) groups before storing once supported
        #             shapes are verified for sublane-axis concatenate.
        for g in range(te // GRP):
            for j in range(GRP):
                k = g * GRP + j
                si = src_ref[e0 + k]
                di = dst_ref[e0 + k]
                out_ref[pl.ds(k, 1), :] = (psrc_ref[pl.ds(si, 1), :]
                                           + pdst_ref[pl.ds(di, 1), :])

        # Bias + log_softmax in place (padded classes carry a -1e30 bias).
        logits = out_ref[...] + bc_ref[...]
        m = jnp.max(logits, axis=1, keepdims=True)
        z = logits - m
        lse = jnp.log(jnp.sum(jnp.exp(z), axis=1, keepdims=True))
        out_ref[...] = z - lse

    return edge_kernel


# ----------------------------------------------------------------------------
# JAX glue.
# ----------------------------------------------------------------------------
def _gcn_norm_dense(edge_index, num_nodes, n_pad):
    """Dense D^-1/2 A D^-1/2 (no self loops), zero-padded to (n_pad, n_pad), bf16."""
    row = edge_index[0]   # source j
    col = edge_index[1]   # target i
    ones = jnp.ones((edge_index.shape[1],), jnp.float32)
    deg = jnp.zeros((num_nodes,), jnp.float32).at[col].add(ones)
    dis = jnp.where(deg > 0, lax.rsqrt(jnp.maximum(deg, 1e-30)), 0.0)
    norm = dis[row] * dis[col]
    a = jnp.zeros((n_pad, n_pad), jnp.float32).at[col, row].add(norm)
    return a.astype(jnp.bfloat16)


def tagcn_edge_forward(x, edge_index, params):
    """x: [N, F] f32, edge_index: [2, E] int32. Returns log-probs [E, edge_classes]."""
    n, f = x.shape
    e = edge_index.shape[1]
    w1, b1, w2, b2, wc, bc = params
    c = wc.shape[1]

    vmem_cap = _tpu_vmem_capacity()

    # ---- padded / tiled geometry (padding is numerically neutral) ----
    n_al = _round_up(max(n, 16), 16)        # 16-row alignment keeps bf16 tiles clean
    tm = _pick_tm(n_al, vmem_cap)           # node row tile (multiple of 16)
    n_pad = _round_up(n_al, tm)
    fw1 = _round_up(max(f, 8), 8)           # layer-1 hop width
    fw2 = HIDDEN                            # layer-2 hop width
    cp = _round_up(c, 8)                    # narrow class pad (NOT 128)
    te = min(128, _round_up(max(e, GRP), GRP))
    e_pad = _round_up(e, te)

    a_hat = _gcn_norm_dense(edge_index, n, n_pad)                        # bf16
    x_pad = (jnp.zeros((n_pad, fw1), jnp.float32).at[:n, :f].set(x)
             .astype(jnp.bfloat16))

    def _flat_hop_w(w, f_in, fw):
        kp1 = w.shape[0]
        wp = jnp.zeros((kp1, fw, HIDDEN), jnp.float32).at[:, :f_in, :].set(w)
        return wp.reshape(kp1 * fw, HIDDEN)

    w1_flat = _flat_hop_w(w1.astype(jnp.float32), f, fw1)
    w2_flat = _flat_hop_w(w2.astype(jnp.float32), HIDDEN, fw2)
    b1_row = b1.reshape(1, HIDDEN).astype(jnp.float32)
    b2_row = b2.reshape(1, HIDDEN).astype(jnp.float32)

    wcs = jnp.zeros((HIDDEN, cp), jnp.float32).at[:, :c].set(wc[:HIDDEN])
    wcd = jnp.zeros((HIDDEN, cp), jnp.float32).at[:, :c].set(wc[HIDDEN:])
    bc_pad = jnp.full((1, cp), NEG_BIG, jnp.float32).at[:, :c].set(bc.reshape(1, c))

    src_idx = jnp.zeros((e_pad,), jnp.int32).at[:e].set(edge_index[0].astype(jnp.int32))
    dst_idx = jnp.zeros((e_pad,), jnp.int32).at[:e].set(edge_index[1].astype(jnp.int32))

    # ---------------- node kernel ----------------
    n_row_tiles = n_pad // tm
    grid_node = (2 * K_HOPS, n_row_tiles)
    const2d = lambda s_, r_: (0, 0)

    weights_bytes = ((K_HOPS + 1) * (fw1 + fw2) * HIDDEN * 4
                     + 2 * HIDDEN * cp * 4 + 2 * HIDDEN * 4)
    scratch_bytes = n_pad * (K_HOPS + 1) * (fw1 + fw2) * 2
    rest_bytes = (2 * n_pad * fw1 * 2 + 2 * weights_bytes
                  + 2 * 2 * n_pad * cp * 4 + scratch_bytes)
    # Keep the whole bf16 A_hat resident when it (conservatively double-buffered)
    # fits with headroom (v5e/v6e 128 MiB); otherwise stream row slabs (v7x).
    a_resident = (2 * n_pad * n_pad * 2 + rest_bytes) <= int(vmem_cap * 0.7)

    if a_resident:
        a_spec = pl.BlockSpec((n_pad, n_pad), const2d)
        a_bytes = 2 * n_pad * n_pad * 2
        a_hbm_reads = n_pad * n_pad * 2                  # streamed from HBM once
    else:
        a_spec = pl.BlockSpec((tm, n_pad), lambda s_, r_: (r_, 0))
        a_bytes = 2 * tm * n_pad * 2
        a_hbm_reads = 2 * K_HOPS * n_pad * n_pad * 2     # re-streamed per hop step

    node_vmem = int(min(max(int(1.5 * (a_bytes + rest_bytes)), 16 * 1024 * 1024),
                        int(vmem_cap * 0.85)))

    node_flops = (2 * K_HOPS * 2 * n_pad * n_pad * max(fw1, fw2)
                  + 2 * n_pad * (K_HOPS + 1) * (fw1 + fw2) * HIDDEN
                  + 2 * 2 * n_pad * HIDDEN * cp)
    node_bytes = (a_hbm_reads + n_pad * fw1 * 2 + weights_bytes
                  + 2 * n_pad * cp * 4)

    p_src, p_dst = pl.pallas_call(
        _make_node_kernel(tm, fw1, fw2, a_resident),
        out_shape=(jax.ShapeDtypeStruct((n_pad, cp), jnp.float32),
                   jax.ShapeDtypeStruct((n_pad, cp), jnp.float32)),
        grid=grid_node,
        in_specs=[
            a_spec,                                               # A_hat (bf16)
            pl.BlockSpec((n_pad, fw1), const2d),                  # x (bf16, resident)
            pl.BlockSpec(((K_HOPS + 1) * fw1, HIDDEN), const2d),  # fused W1
            pl.BlockSpec((1, HIDDEN), const2d),                   # b1
            pl.BlockSpec(((K_HOPS + 1) * fw2, HIDDEN), const2d),  # fused W2
            pl.BlockSpec((1, HIDDEN), const2d),                   # b2
            pl.BlockSpec((HIDDEN, cp), const2d),                  # Wc[:16]
            pl.BlockSpec((HIDDEN, cp), const2d),                  # Wc[16:]
        ],
        out_specs=(pl.BlockSpec((n_pad, cp), const2d),
                   pl.BlockSpec((n_pad, cp), const2d)),
        scratch_shapes=[
            pltpu.VMEM((n_pad, (K_HOPS + 1) * fw1), jnp.bfloat16),  # layer-1 hop slab
            pltpu.VMEM((n_pad, (K_HOPS + 1) * fw2), jnp.bfloat16),  # layer-2 hop slab
        ],
        compiler_params=pltpu.CompilerParams(
            # Both axes MUST stay sequential (every hop step reads all rows of
            # the previous one).
            # TODO(synk): v7x megacore — restructure with core_map +
            #             core_barrier per hop step to use both TensorCores.
            dimension_semantics=("arbitrary", "arbitrary"),
            vmem_limit_bytes=node_vmem),
        cost_estimate=pl.CostEstimate(flops=int(node_flops), transcendentals=0,
                                      bytes_accessed=int(node_bytes)),
    )(a_hat, x_pad, w1_flat, b1_row, w2_flat, b2_row, wcs, wcd)

    # ---------------- edge kernel ----------------
    grid_edge = (e_pad // te,)
    # TODO(synk): for very large E switch src/dst from whole-array scalar
    #             prefetch to per-tile SMEM input blocks to bound SMEM use.
    edge_gs = pltpu.PrefetchScalarGridSpec(
        num_scalar_prefetch=2,                           # src_idx, dst_idx -> SMEM
        grid=grid_edge,
        in_specs=[pl.BlockSpec((n_pad, cp), lambda i, s_, d_: (0, 0)),
                  pl.BlockSpec((n_pad, cp), lambda i, s_, d_: (0, 0)),
                  pl.BlockSpec((1, cp), lambda i, s_, d_: (0, 0))],
        out_specs=pl.BlockSpec((te, cp), lambda i, s_, d_: (i, 0)),
    )
    edge_vmem = int(min(max(8 * 1024 * 1024,
                            4 * (2 * n_pad * cp * 4 + 2 * te * cp * 4)),
                        int(vmem_cap * 0.85)))

    out_pad = pl.pallas_call(
        _make_edge_kernel(te, cp),
        out_shape=jax.ShapeDtypeStruct((e_pad, cp), jnp.float32),
        grid_spec=edge_gs,
        compiler_params=pltpu.CompilerParams(
            dimension_semantics=("parallel",),
            vmem_limit_bytes=edge_vmem),
        cost_estimate=pl.CostEstimate(
            flops=int(4 * e_pad * cp),
            transcendentals=int(e_pad * cp),
            bytes_accessed=int((2 * n_pad * cp + 2 * e_pad * cp) * 4 + 2 * e_pad * 4)),
    )(src_idx, dst_idx, p_src, p_dst, bc_pad)

    return out_pad[:e, :c]


def ref_forward(x, edge_index, params, *, mixed=False):
    """Pure-JAX reference. mixed=True mirrors the kernel's bf16 A + bf16 hop storage."""
    w1, b1, w2, b2, wc, bc = params
    n = x.shape[0]
    row, col = edge_index[0], edge_index[1]
    ones = jnp.ones((edge_index.shape[1],), jnp.float32)
    deg = jnp.zeros((n,), jnp.float32).at[col].add(ones)
    dis = jnp.where(deg > 0, lax.rsqrt(jnp.maximum(deg, 1e-30)), 0.0)
    a = jnp.zeros((n, n), jnp.float32).at[col, row].add(dis[row] * dis[col])
    if mixed:
        a = a.astype(jnp.bfloat16)

    def tagconv(h0, w, b):
        if mixed:
            h = h0.astype(jnp.bfloat16)
            out = h.astype(jnp.float32) @ w[0]
            for k in range(1, K_HOPS + 1):
                h = jnp.dot(a, h, preferred_element_type=jnp.float32).astype(jnp.bfloat16)
                out = out + h.astype(jnp.float32) @ w[k]
        else:
            h = h0
            out = h @ w[0]
            for k in range(1, K_HOPS + 1):
                h = a @ h
                out = out + h @ w[k]
        return out + b

    x1 = jax.nn.relu(tagconv(x, w1, b1))
    x2 = jax.nn.relu(tagconv(x1, w2, b2))
    ef = jnp.concatenate([x2[edge_index[0]], x2[edge_index[1]]], axis=-1)
    logits = ef @ wc + bc
    return jax.nn.log_softmax(logits, axis=1)


if __name__ == "__main__":
    N, F, E, C = 16, 8, 32, 4   # nodes, features, edges, edge_classes

    key = jax.random.PRNGKey(0)
    kx, ke, k1, k2, k3, k4, k5, k6 = jax.random.split(key, 8)

    x = jax.random.normal(kx, (N, F), dtype=jnp.float32)
    edge_index = jax.random.randint(ke, (2, E), 0, N, dtype=jnp.int32)

    # PyTorch Linear weight [out, in] stored transposed as [in, out].
    w1 = 0.1 * jax.random.normal(k1, (K_HOPS + 1, F, HIDDEN), dtype=jnp.float32)
    b1 = 0.1 * jax.random.normal(k2, (HIDDEN,), dtype=jnp.float32)
    w2 = 0.1 * jax.random.normal(k3, (K_HOPS + 1, HIDDEN, HIDDEN), dtype=jnp.float32)
    b2 = 0.1 * jax.random.normal(k4, (HIDDEN,), dtype=jnp.float32)
    wc = 0.1 * jax.random.normal(k5, (2 * HIDDEN, C), dtype=jnp.float32)
    bc = 0.1 * jax.random.normal(k6, (C,), dtype=jnp.float32)
    params = (w1, b1, w2, b2, wc, bc)

    out = jax.block_until_ready(tagcn_edge_forward(x, edge_index, params))
    assert out.shape == (E, C)

    # Tight check vs a reference mirroring the kernel's mixed precision (bf16 A
    # and bf16 hop storage), plus a loose sanity check vs the pure-f32 reference.
    ref_mixed = jax.block_until_ready(ref_forward(x, edge_index, params, mixed=True))
    ref_f32 = jax.block_until_ready(ref_forward(x, edge_index, params, mixed=False))
    assert jnp.allclose(out, ref_mixed, atol=5e-3, rtol=5e-3), "mismatch vs mixed reference"
    assert jnp.allclose(out, ref_f32, atol=1e-1, rtol=1e-1), "mismatch vs f32 reference"

    print("KERNEL_OK")
</pallas_src>

<mosaic_0001>
module attributes {stable_mosaic.version = 11 : i64} {
  func.func @node_kernel(%arg0: i32, %arg1: i32, %arg2: memref<16x16xbf16, #tpu.memory_space<vmem>>, %arg3: memref<16x8xbf16, #tpu.memory_space<vmem>>, %arg4: memref<32x16xf32, #tpu.memory_space<vmem>>, %arg5: memref<1x16xf32, #tpu.memory_space<vmem>>, %arg6: memref<64x16xf32, #tpu.memory_space<vmem>>, %arg7: memref<1x16xf32, #tpu.memory_space<vmem>>, %arg8: memref<16x8xf32, #tpu.memory_space<vmem>>, %arg9: memref<16x8xf32, #tpu.memory_space<vmem>>, %arg10: memref<16x8xf32, #tpu.memory_space<vmem>>, %arg11: memref<16x8xf32, #tpu.memory_space<vmem>>, %arg12: memref<16x32xbf16, #tpu.memory_space<vmem>>, %arg13: memref<16x64xbf16, #tpu.memory_space<vmem>>) attributes {dimension_semantics = [#tpu.dimension_semantics<arbitrary>, #tpu.dimension_semantics<arbitrary>], iteration_bounds = array<i64: 6, 1>, scalar_prefetch = 0 : i64, scratch_operands = 2 : i64, tpu.core_type = #tpu.core_type<tc>, window_params = [{pipeline_mode = #tpu.pipeline_mode<synchronous>, transform_indices = @transform_0, window_bounds = array<i64: 16, 16>}, {pipeline_mode = #tpu.pipeline_mode<synchronous>, transform_indices = @transform_1, window_bounds = array<i64: 16, 8>}, {pipeline_mode = #tpu.pipeline_mode<synchronous>, transform_indices = @transform_2, window_bounds = array<i64: 32, 16>}, {pipeline_mode = #tpu.pipeline_mode<synchronous>, transform_indices = @transform_3, window_bounds = array<i64: 1, 16>}, {pipeline_mode = #tpu.pipeline_mode<synchronous>, transform_indices = @transform_4, window_bounds = array<i64: 64, 16>}, {pipeline_mode = #tpu.pipeline_mode<synchronous>, transform_indices = @transform_5, window_bounds = array<i64: 1, 16>}, {pipeline_mode = #tpu.pipeline_mode<synchronous>, transform_indices = @transform_6, window_bounds = array<i64: 16, 8>}, {pipeline_mode = #tpu.pipeline_mode<synchronous>, transform_indices = @transform_7, window_bounds = array<i64: 16, 8>}, {pipeline_mode = #tpu.pipeline_mode<synchronous>, transform_indices = @transform_8, window_bounds = array<i64: 16, 8>}, {pipeline_mode = #tpu.pipeline_mode<synchronous>, transform_indices = @transform_9, window_bounds = array<i64: 16, 8>}]} {
    %c16_i32 = arith.constant 16 : i32
    %0 = arith.muli %arg1, %c16_i32 : i32
    %1 = tpu.assume_multiple %0, 16 : i32
    %2 = arith.index_cast %1 : i32 to index
    %c0 = arith.constant 0 : index
    %3 = vector.load %arg2[%2, %c0] : memref<16x16xbf16, #tpu.memory_space<vmem>>, vector<16x16xbf16>
    %c0_i32 = arith.constant 0 : i32
    %4 = arith.cmpi eq, %arg0, %c0_i32 : i32
    %5 = arith.extui %4 : i1 to i32
    %c0_i32_0 = arith.constant 0 : i32
    %6 = arith.cmpi ne, %5, %c0_i32_0 : i32
    scf.if %6 {
      %22 = arith.index_cast %1 : i32 to index
      %c0_6 = arith.constant 0 : index
      %23 = vector.load %arg3[%22, %c0_6] : memref<16x8xbf16, #tpu.memory_space<vmem>>, vector<16x8xbf16>
      %24 = arith.index_cast %1 : i32 to index
      %c0_7 = arith.constant 0 : index
      %25 = vector.load %arg12[%24, %c0_7] : memref<16x32xbf16, #tpu.memory_space<vmem>>, vector<16x8xbf16>
      tpu.vector_store %arg12[%24, %c0_7], %23 {strides = array<i32>} : memref<16x32xbf16, #tpu.memory_space<vmem>>, vector<16x8xbf16>,
      %c0_8 = arith.constant 0 : index
      %c0_9 = arith.constant 0 : index
      %26 = vector.load %arg3[%c0_8, %c0_9] : memref<16x8xbf16, #tpu.memory_space<vmem>>, vector<16x8xbf16>
      %cst = arith.constant dense<0.000000e+00> : vector<16x8xf32>
      %27 = tpu.matmul %3, %26, %cst {dimension_numbers = #tpu.dot_dimension_numbers<[1], [0], [0], [1], [0, 0, 1, 1], [], []>} : vector<16x16xbf16>, vector<16x8xbf16>, vector<16x8xf32> -> vector<16x8xf32>
      %28 = arith.truncf %27 : vector<16x8xf32> to vector<16x8xbf16>
      %29 = arith.index_cast %1 : i32 to index
      %c8 = arith.constant 8 : index
      %30 = vector.load %arg12[%29, %c8] : memref<16x32xbf16, #tpu.memory_space<vmem>>, vector<16x8xbf16>
      tpu.vector_store %arg12[%29, %c8], %28 {strides = array<i32>} : memref<16x32xbf16, #tpu.memory_space<vmem>>, vector<16x8xbf16>,
    } else {
    }
    %c1_i32 = arith.constant 1 : i32
    %7 = arith.cmpi eq, %arg0, %c1_i32 : i32
    %8 = arith.extui %7 : i1 to i32
    %c0_i32_1 = arith.constant 0 : i32
    %9 = arith.cmpi ne, %8, %c0_i32_1 : i32
    scf.if %9 {
      %c0_6 = arith.constant 0 : index
      %c8 = arith.constant 8 : index
      %22 = vector.load %arg12[%c0_6, %c8] : memref<16x32xbf16, #tpu.memory_space<vmem>>, vector<16x8xbf16>
      %cst = arith.constant dense<0.000000e+00> : vector<16x8xf32>
      %23 = tpu.matmul %3, %22, %cst {dimension_numbers = #tpu.dot_dimension_numbers<[1], [0], [0], [1], [0, 0, 1, 1], [], []>} : vector<16x16xbf16>, vector<16x8xbf16>, vector<16x8xf32> -> vector<16x8xf32>
      %24 = arith.truncf %23 : vector<16x8xf32> to vector<16x8xbf16>
      %25 = arith.index_cast %1 : i32 to index
      %c16 = arith.constant 16 : index
      %26 = vector.load %arg12[%25, %c16] : memref<16x32xbf16, #tpu.memory_space<vmem>>, vector<16x8xbf16>
      tpu.vector_store %arg12[%25, %c16], %24 {strides = array<i32>} : memref<16x32xbf16, #tpu.memory_space<vmem>>, vector<16x8xbf16>,
    } else {
    }
    %c2_i32 = arith.constant 2 : i32
    %10 = arith.cmpi eq, %arg0, %c2_i32 : i32
    %11 = arith.extui %10 : i1 to i32
    %c0_i32_2 = arith.constant 0 : i32
    %12 = arith.cmpi ne, %11, %c0_i32_2 : i32
    scf.if %12 {
      %c0_6 = arith.constant 0 : index
      %c16 = arith.constant 16 : index
      %22 = vector.load %arg12[%c0_6, %c16] : memref<16x32xbf16, #tpu.memory_space<vmem>>, vector<16x8xbf16>
      %cst = arith.constant dense<0.000000e+00> : vector<16x8xf32>
      %23 = tpu.matmul %3, %22, %cst {dimension_numbers = #tpu.dot_dimension_numbers<[1], [0], [0], [1], [0, 0, 1, 1], [], []>} : vector<16x16xbf16>, vector<16x8xbf16>, vector<16x8xf32> -> vector<16x8xf32>
      %24 = arith.truncf %23 : vector<16x8xf32> to vector<16x8xbf16>
      %25 = arith.index_cast %1 : i32 to index
      %c24 = arith.constant 24 : index
      %26 = vector.load %arg12[%25, %c24] : memref<16x32xbf16, #tpu.memory_space<vmem>>, vector<16x8xbf16>
      tpu.vector_store %arg12[%25, %c24], %24 {strides = array<i32>} : memref<16x32xbf16, #tpu.memory_space<vmem>>, vector<16x8xbf16>,
      %27 = arith.index_cast %1 : i32 to index
      %c0_7 = arith.constant 0 : index
      %28 = vector.load %arg12[%27, %c0_7] : memref<16x32xbf16, #tpu.memory_space<vmem>>, vector<16x32xbf16>
      %29 = arith.extf %28 : vector<16x32xbf16> to vector<16x32xf32>
      %c0_8 = arith.constant 0 : index
      %c0_9 = arith.constant 0 : index
      %30 = vector.load %arg4[%c0_8, %c0_9] : memref<32x16xf32, #tpu.memory_space<vmem>>, vector<32x16xf32>
      %cst_10 = arith.constant dense<0.000000e+00> : vector<16x16xf32>
      %31 = tpu.matmul %29, %30, %cst_10 {dimension_numbers = #tpu.dot_dimension_numbers<[1], [0], [0], [1], [0, 0, 1, 1], [], []>} : vector<16x32xf32>, vector<32x16xf32>, vector<16x16xf32> -> vector<16x16xf32>
      %c0_11 = arith.constant 0 : index
      %c0_12 = arith.constant 0 : index
      %32 = vector.load %arg5[%c0_11, %c0_12] : memref<1x16xf32, #tpu.memory_space<vmem>>, vector<1x16xf32>
      %33 = vector.broadcast %32 : vector<1x16xf32> to vector<16x16xf32>
      %34 = arith.addf %31, %33 : vector<16x16xf32>
      %cst_13 = arith.constant 0.000000e+00 : f32
      %35 = vector.broadcast %cst_13 : f32 to vector<16x16xf32>
      %36 = arith.maximumf %34, %35 : vector<16x16xf32>
      %37 = arith.truncf %36 : vector<16x16xf32> to vector<16x16xbf16>
      %38 = arith.index_cast %1 : i32 to index
      %c0_14 = arith.constant 0 : index
      %39 = vector.load %arg13[%38, %c0_14] : memref<16x64xbf16, #tpu.memory_space<vmem>>, vector<16x16xbf16>
      tpu.vector_store %arg13[%38, %c0_14], %37 {strides = array<i32>} : memref<16x64xbf16, #tpu.memory_space<vmem>>, vector<16x16xbf16>,
    } else {
    }
    %c3_i32 = arith.constant 3 : i32
    %13 = arith.cmpi eq, %arg0, %c3_i32 : i32
    %14 = arith.extui %13 : i1 to i32
    %c0_i32_3 = arith.constant 0 : i32
    %15 = arith.cmpi ne, %14, %c0_i32_3 : i32
    scf.if %15 {
      %c0_6 = arith.constant 0 : index
      %c0_7 = arith.constant 0 : index
      %22 = vector.load %arg13[%c0_6, %c0_7] : memref<16x64xbf16, #tpu.memory_space<vmem>>, vector<16x16xbf16>
      %cst = arith.constant dense<0.000000e+00> : vector<16x16xf32>
      %23 = tpu.matmul %3, %22, %cst {dimension_numbers = #tpu.dot_dimension_numbers<[1], [0], [0], [1], [0, 0, 1, 1], [], []>} : vector<16x16xbf16>, vector<16x16xbf16>, vector<16x16xf32> -> vector<16x16xf32>
      %24 = arith.truncf %23 : vector<16x16xf32> to vector<16x16xbf16>
      %25 = arith.index_cast %1 : i32 to index
      %c16 = arith.constant 16 : index
      %26 = vector.load %arg13[%25, %c16] : memref<16x64xbf16, #tpu.memory_space<vmem>>, vector<16x16xbf16>
      tpu.vector_store %arg13[%25, %c16], %24 {strides = array<i32>} : memref<16x64xbf16, #tpu.memory_space<vmem>>, vector<16x16xbf16>,
    } else {
    }
    %c4_i32 = arith.constant 4 : i32
    %16 = arith.cmpi eq, %arg0, %c4_i32 : i32
    %17 = arith.extui %16 : i1 to i32
    %c0_i32_4 = arith.constant 0 : i32
    %18 = arith.cmpi ne, %17, %c0_i32_4 : i32
    scf.if %18 {
      %c0_6 = arith.constant 0 : index
      %c16 = arith.constant 16 : index
      %22 = vector.load %arg13[%c0_6, %c16] : memref<16x64xbf16, #tpu.memory_space<vmem>>, vector<16x16xbf16>
      %cst = arith.constant dense<0.000000e+00> : vector<16x16xf32>
      %23 = tpu.matmul %3, %22, %cst {dimension_numbers = #tpu.dot_dimension_numbers<[1], [0], [0], [1], [0, 0, 1, 1], [], []>} : vector<16x16xbf16>, vector<16x16xbf16>, vector<16x16xf32> -> vector<16x16xf32>
      %24 = arith.truncf %23 : vector<16x16xf32> to vector<16x16xbf16>
      %25 = arith.index_cast %1 : i32 to index
      %c32 = arith.constant 32 : index
      %26 = vector.load %arg13[%25, %c32] : memref<16x64xbf16, #tpu.memory_space<vmem>>, vector<16x16xbf16>
      tpu.vector_store %arg13[%25, %c32], %24 {strides = array<i32>} : memref<16x64xbf16, #tpu.memory_space<vmem>>, vector<16x16xbf16>,
    } else {
    }
    %c5_i32 = arith.constant 5 : i32
    %19 = arith.cmpi eq, %arg0, %c5_i32 : i32
    %20 = arith.extui %19 : i1 to i32
    %c0_i32_5 = arith.constant 0 : i32
    %21 = arith.cmpi ne, %20, %c0_i32_5 : i32
    scf.if %21 {
      %c0_6 = arith.constant 0 : index
      %c32 = arith.constant 32 : index
      %22 = vector.load %arg13[%c0_6, %c32] : memref<16x64xbf16, #tpu.memory_space<vmem>>, vector<16x16xbf16>
      %cst = arith.constant dense<0.000000e+00> : vector<16x16xf32>
      %23 = tpu.matmul %3, %22, %cst {dimension_numbers = #tpu.dot_dimension_numbers<[1], [0], [0], [1], [0, 0, 1, 1], [], []>} : vector<16x16xbf16>, vector<16x16xbf16>, vector<16x16xf32> -> vector<16x16xf32>
      %24 = arith.truncf %23 : vector<16x16xf32> to vector<16x16xbf16>
      %25 = arith.index_cast %1 : i32 to index
      %c48 = arith.constant 48 : index
      %26 = vector.load %arg13[%25, %c48] : memref<16x64xbf16, #tpu.memory_space<vmem>>, vector<16x16xbf16>
      tpu.vector_store %arg13[%25, %c48], %24 {strides = array<i32>} : memref<16x64xbf16, #tpu.memory_space<vmem>>, vector<16x16xbf16>,
      %27 = arith.index_cast %1 : i32 to index
      %c0_7 = arith.constant 0 : index
      %28 = vector.load %arg13[%27, %c0_7] : memref<16x64xbf16, #tpu.memory_space<vmem>>, vector<16x64xbf16>
      %29 = arith.extf %28 : vector<16x64xbf16> to vector<16x64xf32>
      %c0_8 = arith.constant 0 : index
      %c0_9 = arith.constant 0 : index
      %30 = vector.load %arg6[%c0_8, %c0_9] : memref<64x16xf32, #tpu.memory_space<vmem>>, vector<64x16xf32>
      %cst_10 = arith.constant dense<0.000000e+00> : vector<16x16xf32>
      %31 = tpu.matmul %29, %30, %cst_10 {dimension_numbers = #tpu.dot_dimension_numbers<[1], [0], [0], [1], [0, 0, 1, 1], [], []>} : vector<16x64xf32>, vector<64x16xf32>, vector<16x16xf32> -> vector<16x16xf32>
      %c0_11 = arith.constant 0 : index
      %c0_12 = arith.constant 0 : index
      %32 = vector.load %arg7[%c0_11, %c0_12] : memref<1x16xf32, #tpu.memory_space<vmem>>, vector<1x16xf32>
      %33 = vector.broadcast %32 : vector<1x16xf32> to vector<16x16xf32>
      %34 = arith.addf %31, %33 : vector<16x16xf32>
      %cst_13 = arith.constant 0.000000e+00 : f32
      %35 = vector.broadcast %cst_13 : f32 to vector<16x16xf32>
      %36 = arith.maximumf %34, %35 : vector<16x16xf32>
      %c0_14 = arith.constant 0 : index
      %c0_15 = arith.constant 0 : index
      %37 = vector.load %arg8[%c0_14, %c0_15] : memref<16x8xf32, #tpu.memory_space<vmem>>, vector<16x8xf32>
      %cst_16 = arith.constant dense<0.000000e+00> : vector<16x8xf32>
      %38 = tpu.matmul %36, %37, %cst_16 {dimension_numbers = #tpu.dot_dimension_numbers<[1], [0], [0], [1], [0, 0, 1, 1], [], []>} : vector<16x16xf32>, vector<16x8xf32>, vector<16x8xf32> -> vector<16x8xf32>
      %39 = arith.index_cast %1 : i32 to index
      %c0_17 = arith.constant 0 : index
      %40 = vector.load %arg10[%39, %c0_17] : memref<16x8xf32, #tpu.memory_space<vmem>>, vector<16x8xf32>
      tpu.vector_store %arg10[%39, %c0_17], %38 {strides = array<i32>} : memref<16x8xf32, #tpu.memory_space<vmem>>, vector<16x8xf32>,
      %c0_18 = arith.constant 0 : index
      %c0_19 = arith.constant 0 : index
      %41 = vector.load %arg9[%c0_18, %c0_19] : memref<16x8xf32, #tpu.memory_space<vmem>>, vector<16x8xf32>
      %cst_20 = arith.constant dense<0.000000e+00> : vector<16x8xf32>
      %42 = tpu.matmul %36, %41, %cst_20 {dimension_numbers = #tpu.dot_dimension_numbers<[1], [0], [0], [1], [0, 0, 1, 1], [], []>} : vector<16x16xf32>, vector<16x8xf32>, vector<16x8xf32> -> vector<16x8xf32>
      %43 = arith.index_cast %1 : i32 to index
      %c0_21 = arith.constant 0 : index
      %44 = vector.load %arg11[%43, %c0_21] : memref<16x8xf32, #tpu.memory_space<vmem>>, vector<16x8xf32>
      tpu.vector_store %arg11[%43, %c0_21], %42 {strides = array<i32>} : memref<16x8xf32, #tpu.memory_space<vmem>>, vector<16x8xf32>,
    } else {
    }
    return
  }
  func.func @transform_0(%arg0: i32, %arg1: i32) -> (i32, i32) {
    %c0_i32 = arith.constant 0 : i32
    %c0_i32_0 = arith.constant 0 : i32
    %c0_i32_1 = arith.constant 0 : i32
    return %c0_i32, %c0_i32_0 : i32, i32
  }
  func.func @transform_1(%arg0: i32, %arg1: i32) -> (i32, i32) {
    %c0_i32 = arith.constant 0 : i32
    %c0_i32_0 = arith.constant 0 : i32
    %c0_i32_1 = arith.constant 0 : i32
    return %c0_i32, %c0_i32_0 : i32, i32
  }
  func.func @transform_2(%arg0: i32, %arg1: i32) -> (i32, i32) {
    %c0_i32 = arith.constant 0 : i32
    %c0_i32_0 = arith.constant 0 : i32
    %c0_i32_1 = arith.constant 0 : i32
    return %c0_i32, %c0_i32_0 : i32, i32
  }
  func.func @transform_3(%arg0: i32, %arg1: i32) -> (i32, i32) {
    %c0_i32 = arith.constant 0 : i32
    %c0_i32_0 = arith.constant 0 : i32
    %c0_i32_1 = arith.constant 0 : i32
    return %c0_i32, %c0_i32_0 : i32, i32
  }
  func.func @transform_4(%arg0: i32, %arg1: i32) -> (i32, i32) {
    %c0_i32 = arith.constant 0 : i32
    %c0_i32_0 = arith.constant 0 : i32
    %c0_i32_1 = arith.constant 0 : i32
    return %c0_i32, %c0_i32_0 : i32, i32
  }
  func.func @transform_5(%arg0: i32, %arg1: i32) -> (i32, i32) {
    %c0_i32 = arith.constant 0 : i32
    %c0_i32_0 = arith.constant 0 : i32
    %c0_i32_1 = arith.constant 0 : i32
    return %c0_i32, %c0_i32_0 : i32, i32
  }
  func.func @transform_6(%arg0: i32, %arg1: i32) -> (i32, i32) {
    %c0_i32 = arith.constant 0 : i32
    %c0_i32_0 = arith.constant 0 : i32
    %c0_i32_1 = arith.constant 0 : i32
    return %c0_i32, %c0_i32_0 : i32, i32
  }
  func.func @transform_7(%arg0: i32, %arg1: i32) -> (i32, i32) {
    %c0_i32 = arith.constant 0 : i32
    %c0_i32_0 = arith.constant 0 : i32
    %c0_i32_1 = arith.constant 0 : i32
    return %c0_i32, %c0_i32_0 : i32, i32
  }
  func.func @transform_8(%arg0: i32, %arg1: i32) -> (i32, i32) {
    %c0_i32 = arith.constant 0 : i32
    %c0_i32_0 = arith.constant 0 : i32
    %c0_i32_1 = arith.constant 0 : i32
    return %c0_i32, %c0_i32_0 : i32, i32
  }
  func.func @transform_9(%arg0: i32, %arg1: i32) -> (i32, i32) {
    %c0_i32 = arith.constant 0 : i32
    %c0_i32_0 = arith.constant 0 : i32
    %c0_i32_1 = arith.constant 0 : i32
    return %c0_i32, %c0_i32_0 : i32, i32
  }
}

</mosaic_0001>

<bundles_post_ra>
// kernel: tpu_custom_call.1
= control target key start
LH: loop header
LB: loop body
LE: loop exit
PB: predicated region body
PF: predicated region fallthrough
CT: control target
= control target key end

     0   :  { %s1497_s30 = smov 0   ;;  %s1499_s10 = smov 0   ;;  %s1633_s0 = inlined_call_operand.vmem [shape: bf16[16,16], index: 0, kind: input, shape index: {}]   ;;  %s1634_s1 = inlined_call_operand.vmem [shape: bf16[16,8], index: 1, kind: input, shape index: {}]   ;;  %s1635_s2 = inlined_call_operand.vmem [shape: f32[32,16], index: 2, kind: input, shape index: {}]   ;;  %s1636_s3 = inlined_call_operand.vmem [shape: f32[1,16], index: 3, kind: input, shape index: {}]   ;;  %s1637_s4 = inlined_call_operand.vmem [shape: f32[64,16], index: 4, kind: input, shape index: {}]   ;;  %s1638_s5 = inlined_call_operand.vmem [shape: f32[1,16], index: 5, kind: input, shape index: {}]   ;;  %s1639_s6 = inlined_call_operand.vmem [shape: f32[16,8], index: 6, kind: input, shape index: {}]   ;;  %s1640_s7 = inlined_call_operand.vmem [shape: f32[16,8], index: 7, kind: input, shape index: {}]   ;;  %s1641_s8 = inlined_call_operand.vmem [shape: f32[16,8], index: 8, kind: output, shape index: {0}]   ;;  %s1642_s9 = inlined_call_operand.vmem [shape: f32[16,8], index: 9, kind: output, shape index: {1}]  }
   0x1   :  { %s1501_s11 = smov 0  }
   0x2 LB: > { %s32_s12 = sadd.s32 1, %s1419_s10  ;;  %p1172_p0 = scmp.ge.s32.totalorder %s1423_s11, 1  ;;  %s1423_s11 = sphi %s1501_s11, %s20_s11   ;;  %s1419_s10 = sphi %s1499_s10, %s1644_s10   ;;  %s1415_s30 = sphi %s1497_s30, %s1643_s30  }
   0x3   : > { %p34_p1 = scmp.ge.s32.totalorder %s32_s12, 6  ;;  %p282_p2 = scmp.lt.s32.totalorder %s1423_s11, 7 }
   0x5   : > { %s1646_s12 = smov (%p34_p1, %s32_s12), 0  ;;  %p283_p3 = pnand %p1172_p0, %p282_p2 }
   0x6   : > { %v1520_v0 = vld [vmem:[%s1633_s0] sm:$0xf] (!%p283_p3)  ;;  %v1525_v1 = vld [vmem:[%s1633_s0 + $0x4] sm:$0xf] (!%p283_p3)  ;;  %p1173_p4 = scmp.ne.s32.totalorder (!%p283_p3), %s1415_s30, 0 }
   0x7   : > { %286 = sbr.rel (%p283_p3) target bundleno = 3197 (0xc7d), region = 52 }
   0xe   : > { %319 = sbr.rel (%p1173_p4) target bundleno = 351 (0x15f), region = 56  ;;  %v1399_v2 = vld [vmem:[%s1634_s1] sm:$0xff] (!%p1173_p4)   ;;  %v1425_v3 = vmov (!%p1173_p4), 0.0   ;;  %v1175_v4 = vcombine.low (!%p1173_p4), %v1520_v0, %v1525_v1  ;;  %vm1426_vm0 = vmmov (!%p1173_p4), 0   ;;  %vm349_vm1 = vcmask (!%p1173_p4), 130048   ;;  %s1427_s21 = smov (!%p1173_p4), 8  }
   0xf   : > { %1241 = vmatprep.subr.bf16.mxu0 (!%p1173_p4), %v1425_v3  ;;  %1243 = vmatprep.mubr.msk.bf16.mxu0 (!%p1173_p4), %vm1426_vm0, %v1425_v3  ;;  %v1400_v5 = vld [vmem:[%s1634_s1] sm:$0xff] (!%p1173_p4)   ;;  %vm334_vm2 = vcmask (!%p1173_p4), 64512   ;;  %vm399_vm3 = vcmask (!%p1173_p4), 130112  }
  0x10   : > { %1242 = vmatpush3.bf16.msra.mxu0 (!%p1173_p4), %v1399_v2  ;;  %335 = vst.msk [vmem:[#allocation2] sm:$0xff] (!%p1173_p4), %vm334_vm2, %v1400_v5 }
  0x13   : > { %1244 = vmatmul.mubr.msk.bf16.vlgmr.msra.gmra.mrb[0].mxu0 (!%p1173_p4), %vm349_vm1, %v1175_v4 }
  0xe6   : > { %v387_v6 = vpop.f32.mrb[0].mxu0 }
  0xe7   : > { %v1245_v7 = vpop.f32.mrb[1].mxu0 }
  0xe8   : > { %v390_v8 = vpop.f32.mrb[2].mxu0 }
  0xe9   : > { %v394_v9 = vpack.c.bf16 %v390_v8, %v387_v6  ;;  %v1246_v10 = vpop.f32.mrb[3].mxu0 }
  0xeb   : > { %396 = vrot.lane.b32.xlu0 %v394_v9, %s1427_s21 }
 0x15d   : > { %v397_v11 = vpop.permute.xlu0 %396 }
 0x15e   : > { %400 = vst.msk [vmem:[#allocation2] sm:$0xff] %vm399_vm3, %v397_v11 }
 0x15f PF: > { %p1178_p5 = scmp.ne.s32.totalorder %s1415_s30, 1 }
 0x160   : > { %s1428_s22 = smov (!%p1178_p5), 120   ;;  %v1429_v13 = vmov (!%p1178_p5), 0.0   ;;  %vm1430_vm4 = vmmov (!%p1178_p5), 0   ;;  %v1179_v15 = vcombine.low (!%p1178_p5), %v1520_v0, %v1525_v1  ;;  %vm415_vm5 = vcmask (!%p1178_p5), 130048   ;;  %s1431_s23 = smov (!%p1178_p5), 16  }
 0x161   : > { %404 = sbr.rel (%p1178_p5) target bundleno = 808 (0x328), region = 60  ;;  %1247 = vmatprep.subr.bf16.mxu0 (!%p1178_p5), %v1429_v13  ;;  %1249 = vmatprep.mubr.msk.bf16.mxu0 (!%p1178_p5), %vm1430_vm4, %v1429_v13  ;;  %vm469_vm6 = vcmask (!%p1178_p5), 195712  }
 0x165   : > { %v405_v12 = vld [vmem:[#allocation2] sm:$0xff] (!%p1178_p5) }
 0x166   : > { %412 = vrot.lane.b32.xlu0 (!%p1178_p5), %v405_v12, %s1428_s22 }
 0x1d8   : > { %v413_v14 = vpop.permute.xlu0 %412 }
 0x1d9   : > { %1248 = vmatpush3.bf16.msra.mxu0 %v413_v14 }
 0x1dc   : > { %1250 = vmatmul.mubr.msk.bf16.vlgmr.msra.gmra.mrb[0].mxu0 %vm415_vm5, %v1179_v15 }
 0x2af   : > { %v453_v16 = vpop.f32.mrb[0].mxu0 }
 0x2b0   : > { %v1251_v17 = vpop.f32.mrb[1].mxu0 }
 0x2b1   : > { %v456_v18 = vpop.f32.mrb[2].mxu0 }
 0x2b2   : > { %v460_v19 = vpack.c.bf16 %v456_v18, %v453_v16  ;;  %v1252_v20 = vpop.f32.mrb[3].mxu0 }
 0x2b4   : > { %462 = vrot.lane.b32.xlu0 %v460_v19, %s1431_s23 }
 0x326   : > { %v463_v21 = vpop.permute.xlu0 %462 }
 0x327   : > { %470 = vst.msk [vmem:[#allocation2] sm:$0xff] %vm469_vm6, %v463_v21 }
 0x328 PF: > { %p1181_p6 = scmp.ne.s32.totalorder %s1415_s30, 2 }
 0x329   : > { %s1432_s24 = smov (!%p1181_p6), 112   ;;  %v1433_v23 = vmov (!%p1181_p6), 0.0   ;;  %vm1434_vm7 = vmmov (!%p1181_p6), 0   ;;  %v1182_v25 = vcombine.low (!%p1181_p6), %v1520_v0, %v1525_v1  ;;  %vm485_vm8 = vcmask (!%p1181_p6), 130048   ;;  %v544_v26 = vld [vmem:[%s1635_s2] sm:$0xff] (!%p1181_p6)  ;;  %v545_v27 = vld [vmem:[%s1635_s2 + $0x8] sm:$0xff] (!%p1181_p6) }
 0x32a   : > { %474 = sbr.rel (%p1181_p6) target bundleno = 1495 (0x5d7), region = 64  ;;  %1253 = vmatprep.subr.bf16.mxu0 (!%p1181_p6), %v1433_v23  ;;  %1255 = vmatprep.mubr.msk.bf16.mxu0 (!%p1181_p6), %vm1434_vm7, %v1433_v23  ;;  %v546_v28 = vld [vmem:[%s1635_s2 + $0x10] sm:$0xff] (!%p1181_p6)  ;;  %v1321_v29 = vpack.c.bf16 (!%p1181_p6), %v545_v27, %v544_v26  ;;  %v547_v30 = vld [vmem:[%s1635_s2 + $0x18] sm:$0xff] (!%p1181_p6)  ;;  %s1435_s16 = smov (!%p1181_p6), 24   ;;  %vm539_vm9 = vcmask (!%p1181_p6), 261312   ;;  %vm555_vm10 = vcmask (!%p1181_p6), 261120  }
 0x32b   : > { %v1325_v31 = vpack.c.bf16 (!%p1181_p6), %v547_v30, %v546_v28  ;;  %v1184_v41 = vld [vmem:[%s1636_s3] ss:$0 sm:$0xff] (!%p1181_p6) }
 0x32c   : > { %1322 = vmatprep.subr.bf16.mxu1 (!%p1181_p6), %v1321_v29 }
 0x32d   : > { %1324 = vmatpush3.bf16.msra.mxu1 (!%p1181_p6), %v1321_v29 }
 0x32e   : > { %v475_v22 = vld [vmem:[#allocation2] sm:$0xff] (!%p1181_p6)  ;;  %1326 = vmatprep.subr.bf16.mxu1 (!%p1181_p6), %v1325_v31 }
 0x32f   : > { %482 = vrot.lane.b32.xlu0 (!%p1181_p6), %v475_v22, %s1432_s24 }
 0x331   : > { %1328 = vmatpush3.bf16.msra.mxu1 %v1325_v31 }
 0x3a1   : > { %v483_v24 = vpop.permute.xlu0 %482 }
 0x3a2   : > { %1254 = vmatpush3.bf16.msra.mxu0 %v483_v24 }
 0x3a5   : > { %1256 = vmatmul.mubr.msk.bf16.vlgmr.msra.gmra.mrb[0].mxu0 %vm485_vm8, %v1182_v25 }
 0x478   : > { %v523_v32 = vpop.f32.mrb[0].mxu0 }
 0x479   : > { %v1257_v33 = vpop.f32.mrb[1].mxu0 }
 0x47a   : > { %v526_v34 = vpop.f32.mrb[2].mxu0 }
 0x47b   : > { %v530_v35 = vpack.c.bf16 %v526_v34, %v523_v32  ;;  %v1258_v36 = vpop.f32.mrb[3].mxu0 }
 0x47d   : > { %532 = vrot.lane.b32.xlu0 %v530_v35, %s1435_s16 }
 0x4ef   : > { %v533_v37 = vpop.permute.xlu0 %532 }
 0x4f0   : > { %540 = vst.msk [vmem:[#allocation2] sm:$0xff] %vm539_vm9, %v533_v37 }
 0x4f7   : > { %v541_v38 = vld [vmem:[#allocation2] sm:$0xff] }
 0x4f8   : > { %v542_v39 = vunpack.c.l.bf16 %v541_v38  ;;  %v543_v40 = vunpack.c.h.bf16 %v541_v38 }
 0x4fa   : > { %1267 = vmatprep.mubr.msk.f32.mxu1 %vm555_vm10, %v542_v39 }
 0x4fb   : > { %1268 = vmatmul.mubr.msk.f32.vlgmr.msra.gmra.mrb[0].mxu1 %vm555_vm10, %v543_v40 }
 0x5ce   : > { %v1269_v42 = vpop.f32.mrb[0].mxu1 }
 0x5cf   : > { %v634_v43 = vadd.f32 %v1269_v42, %v1184_v41  ;;  %v628_v44 = vpop.f32.mrb[1].mxu1 }
 0x5d0   : > { %v629_v45 = vadd.f32 %v1184_v41, %v628_v44 }
 0x5d1   : > { %v638_v46 = vmax.f32 %v634_v43, 0.0 }
 0x5d2   : > { %v637_v47 = vmax.f32 %v629_v45, 0.0 }
 0x5d4   : > { %v639_v48 = vpack.c.bf16 %v638_v46, %v637_v47 }
 0x5d6   : > { %642 = vst.msk [vmem:[#allocation3] sm:$0xff] %vm485_vm8, %v639_v48 }
 0x5d7 PF: > { %p1187_p7 = scmp.ne.s32.totalorder %s1415_s30, 3 }
 0x5d8   : > { %v1436_v50 = vmov (!%p1187_p7), 0.0   ;;  %vm1437_vm11 = vmmov (!%p1187_p7), 0   ;;  %v1188_v51 = vcombine.low (!%p1187_p7), %v1520_v0, %v1525_v1  ;;  %vm653_vm12 = vcmask (!%p1187_p7), 130048   ;;  %s1438_s19 = smov (!%p1187_p7), 16  }
 0x5d9   : > { %646 = sbr.rel (%p1187_p7) target bundleno = 1837 (0x72d), region = 68  ;;  %1270 = vmatprep.subr.bf16.mxu0 (!%p1187_p7), %v1436_v50  ;;  %1272 = vmatprep.mubr.msk.bf16.mxu0 (!%p1187_p7), %vm1437_vm11, %v1436_v50  ;;  %vm707_vm13 = vcmask (!%p1187_p7), 261248  }
 0x5dd   : > { %v647_v49 = vld [vmem:[#allocation3] sm:$0xff] (!%p1187_p7) }
 0x5de   : > { %1271 = vmatpush3.bf16.msra.mxu0 (!%p1187_p7), %v647_v49 }
 0x5e1   : > { %1273 = vmatmul.mubr.msk.bf16.vlgmr.msra.gmra.mrb[0].mxu0 %vm653_vm12, %v1188_v51 }
 0x6b4   : > { %v691_v52 = vpop.f32.mrb[0].mxu0 }
 0x6b5   : > { %v1274_v53 = vpop.f32.mrb[1].mxu0 }
 0x6b6   : > { %v694_v54 = vpop.f32.mrb[2].mxu0 }
 0x6b7   : > { %v698_v55 = vpack.c.bf16 %v694_v54, %v691_v52  ;;  %v1275_v56 = vpop.f32.mrb[3].mxu0 }
 0x6b9   : > { %700 = vrot.lane.b32.xlu0 %v698_v55, %s1438_s19 }
 0x72b   : > { %v701_v57 = vpop.permute.xlu0 %700 }
 0x72c   : > { %708 = vst.msk [vmem:[#allocation3] sm:$0xff] %vm707_vm13, %v701_v57 }
 0x72d PF: > { %p1190_p8 = scmp.ne.s32.totalorder %s1415_s30, 4 }
 0x72e   : > { %s1439_s20 = smov (!%p1190_p8), 112   ;;  %v1440_v59 = vmov (!%p1190_p8), 0.0   ;;  %vm1441_vm14 = vmmov (!%p1190_p8), 0   ;;  %v1191_v61 = vcombine.low (!%p1190_p8), %v1520_v0, %v1525_v1  ;;  %vm723_vm15 = vcmask (!%p1190_p8), 130048   ;;  %s1442_s21 = smov (!%p1190_p8), 32  }
 0x72f   : > { %712 = sbr.rel (%p1190_p8) target bundleno = 2294 (0x8f6), region = 72  ;;  %1276 = vmatprep.subr.bf16.mxu0 (!%p1190_p8), %v1440_v59  ;;  %1278 = vmatprep.mubr.msk.bf16.mxu0 (!%p1190_p8), %vm1441_vm14, %v1440_v59  ;;  %vm777_vm0 = vcmask (!%p1190_p8), 392448  }
 0x733   : > { %v713_v58 = vld [vmem:[#allocation3] sm:$0xff] (!%p1190_p8) }
 0x734   : > { %720 = vrot.lane.b32.xlu0 (!%p1190_p8), %v713_v58, %s1439_s20 }
 0x7a6   : > { %v721_v60 = vpop.permute.xlu0 %720 }
 0x7a7   : > { %1277 = vmatpush3.bf16.msra.mxu0 %v721_v60 }
 0x7aa   : > { %1279 = vmatmul.mubr.msk.bf16.vlgmr.msra.gmra.mrb[0].mxu0 %vm723_vm15, %v1191_v61 }
 0x87d   : > { %v761_v62 = vpop.f32.mrb[0].mxu0 }
 0x87e   : > { %v1280_v63 = vpop.f32.mrb[1].mxu0 }
 0x87f   : > { %v764_v2 = vpop.f32.mrb[2].mxu0 }
 0x880   : > { %v768_v3 = vpack.c.bf16 %v764_v2, %v761_v62  ;;  %v1281_v4 = vpop.f32.mrb[3].mxu0 }
 0x882   : > { %770 = vrot.lane.b32.xlu0 %v768_v3, %s1442_s21 }
 0x8f4   : > { %v771_v5 = vpop.permute.xlu0 %770 }
 0x8f5   : > { %778 = vst.msk [vmem:[#allocation3] sm:$0xff] %vm777_vm0, %v771_v5 }
 0x8f6 PF: > { %p1193_p9 = scmp.ne.s32.totalorder %s1415_s30, 5 }
 0x8f7   : > { %s1443_s22 = smov (!%p1193_p9), 96   ;;  %v1444_v7 = vmov (!%p1193_p9), 0.0   ;;  %vm1445_vm1 = vmmov (!%p1193_p9), 0   ;;  %v1194_v9 = vcombine.low (!%p1193_p9), %v1520_v0, %v1525_v1  ;;  %vm793_vm2 = vcmask (!%p1193_p9), 130048   ;;  %v852_v10 = vld [vmem:[%s1637_s4] sm:$0xff] (!%p1193_p9)  ;;  %v853_v11 = vld [vmem:[%s1637_s4 + $0x8] sm:$0xff] (!%p1193_p9) }
 0x8f8   : > { %782 = sbr.rel (%p1193_p9) target bundleno = 3197 (0xc7d), region = 76  ;;  %1282 = vmatprep.subr.bf16.mxu0 (!%p1193_p9), %v1444_v7  ;;  %1284 = vmatprep.mubr.msk.bf16.mxu0 (!%p1193_p9), %vm1445_vm1, %v1444_v7  ;;  %v854_v12 = vld [vmem:[%s1637_s4 + $0x10] sm:$0xff] (!%p1193_p9)  ;;  %v1329_v13 = vpack.c.bf16 (!%p1193_p9), %v853_v11, %v852_v10  ;;  %v855_v0 = vld [vmem:[%s1637_s4 + $0x18] sm:$0xff] (!%p1193_p9)  ;;  %v856_v14 = vld [vmem:[%s1637_s4 + $0x20] sm:$0xff] (!%p1193_p9)  ;;  %s1446_s30 = smov (!%p1193_p9), 48   ;;  %vm847_vm3 = vcmask (!%p1193_p9), 523648  }
 0x8f9   : > { %v1333_v1 = vpack.c.bf16 (!%p1193_p9), %v855_v0, %v854_v12  ;;  %v857_v15 = vld [vmem:[%s1637_s4 + $0x28] sm:$0xff] (!%p1193_p9)  ;;  %v858_v16 = vld [vmem:[%s1637_s4 + $0x30] sm:$0xff] (!%p1193_p9)  ;;  %v859_v18 = vld [vmem:[%s1637_s4 + $0x38] sm:$0xff] (!%p1193_p9)  ;;  %vm867_vm4 = vcmask (!%p1193_p9), 523264   ;;  %vm1035_vm5 = vcmask (!%p1193_p9), 64512  }
 0x8fa   : > { %1330 = vmatprep.subr.bf16.mxu1 (!%p1193_p9), %v1329_v13  ;;  %v1337_v17 = vpack.c.bf16 (!%p1193_p9), %v857_v15, %v856_v14  ;;  %v1341_v19 = vpack.c.bf16 (!%p1193_p9), %v859_v18, %v858_v16  ;;  %v951_v25 = vld [vmem:[%s1639_s6] sm:$0xff] (!%p1193_p9)  ;;  %v952_v26 = vld [vmem:[%s1639_s6 + $0x8] sm:$0xff] (!%p1193_p9) }
 0x8fb   : > { %1332 = vmatpush3.bf16.msra.mxu1 (!%p1193_p9), %v1329_v13  ;;  %v1345_v27 = vpack.c.bf16 (!%p1193_p9), %v952_v26, %v951_v25  ;;  %v1038_v32 = vld [vmem:[%s1640_s7] sm:$0xff] (!%p1193_p9)  ;;  %v1039_v33 = vld [vmem:[%s1640_s7 + $0x8] sm:$0xff] (!%p1193_p9) }
 0x8fc   : > { %v783_v6 = vld [vmem:[#allocation3] sm:$0xff] (!%p1193_p9)  ;;  %1334 = vmatprep.subr.bf16.mxu1 (!%p1193_p9), %v1333_v1  ;;  %v1349_v34 = vpack.c.bf16 (!%p1193_p9), %v1039_v33, %v1038_v32  ;;  %v1196_v35 = vld [vmem:[%s1638_s5] ss:$0 sm:$0xff] (!%p1193_p9) }
 0x8fd   : > { %790 = vrot.lane.b32.xlu0 (!%p1193_p9), %v783_v6, %s1443_s22 }
 0x8ff   : > { %1336 = vmatpush3.bf16.msra.mxu1 %v1333_v1 }
 0x900   : > { %1338 = vmatprep.subr.bf16.mxu1 %v1337_v17 }
 0x903   : > { %1340 = vmatpush3.bf16.msra.mxu1 %v1337_v17 }
 0x904   : > { %1342 = vmatprep.subr.bf16.mxu1 %v1341_v19 }
 0x907   : > { %1344 = vmatpush3.bf16.msra.mxu1 %v1341_v19 }
 0x96f   : > { %v791_v8 = vpop.permute.xlu0 %790 }
 0x970   : > { %1283 = vmatpush3.bf16.msra.mxu0 %v791_v8 }
 0x971   : > { %1346 = vmatprep.subr.bf16.mxu0 %v1345_v27 }
 0x973   : > { %1285 = vmatmul.mubr.msk.bf16.vlgmr.msra.gmra.mrb[0].mxu0 %vm793_vm2, %v1194_v9 }
 0x974   : > { %1348 = vmatpush3.bf16.msra.mxu0 %v1345_v27 }
 0x975   : > { %1350 = vmatprep.subr.bf16.mxu0 %v1349_v34 }
 0xa46   : > { %v831_v20 = vpop.f32.mrb[0].mxu0 }
 0xa47   : > { %v1286_v21 = vpop.f32.mrb[1].mxu0 }
 0xa48   : > { %v834_v22 = vpop.f32.mrb[2].mxu0 }
 0xa49   : > { %v838_v23 = vpack.c.bf16 %v834_v22, %v831_v20  ;;  %v1287_v24 = vpop.f32.mrb[3].mxu0 }
 0xa4b   : > { %840 = vrot.lane.b32.xlu0 %v838_v23, %s1446_s30 }
 0xabd   : > { %v841_v28 = vpop.permute.xlu0 %840 }
 0xabe   : > { %848 = vst.msk [vmem:[#allocation3] sm:$0xff] %vm847_vm3, %v841_v28 }
 0xac5   : > { %v849_v29 = vld [vmem:[#allocation3] sm:$0xff] }
 0xac6   : > { %v850_v30 = vunpack.c.l.bf16 %v849_v29  ;;  %v851_v31 = vunpack.c.h.bf16 %v849_v29 }
 0xac8   : > { %1304 = vmatprep.mubr.msk.f32.mxu1 %vm867_vm4, %v850_v30 }
 0xac9   : > { %1305 = vmatmul.mubr.msk.f32.vlgmr.msra.gmra.mrb[0].mxu1 %vm867_vm4, %v851_v31 }
 0xb9c   : > { %v1306_v36 = vpop.f32.mrb[0].mxu1 }
 0xb9d   : > { %v946_v37 = vadd.f32 %v1306_v36, %v1196_v35  ;;  %v940_v38 = vpop.f32.mrb[1].mxu1 }
 0xb9e   : > { %v941_v39 = vadd.f32 %v1196_v35, %v940_v38 }
 0xb9f   : > { %v950_v41 = vmax.f32 %v946_v37, 0.0 }
 0xba0   : > { %v949_v40 = vmax.f32 %v941_v39, 0.0 }
 0xba2   : > { %1311 = vmatprep.mubr.msk.f32.mxu0 %vm793_vm2, %v949_v40 }
 0xba3   : > { %1312 = vmatmul.mubr.msk.f32.vlgmr.msra.gmra.mrb[4].mxu0 %vm793_vm2, %v950_v41 }
 0xba4   : > { %1352 = vmatpush3.bf16.msra.mxu0 %v1349_v34  ;;  %1318 = vmatprep.mubr.msk.f32.mxu0 %vm793_vm2, %v949_v40 }
 0xba7   : > { %1319 = vmatmul.mubr.msk.f32.vlgmr.msra.gmra.mrb[6].mxu0 %vm793_vm2, %v950_v41 }
 0xc76   : > { %v1313_v42 = vpop.f32.mrb[4].mxu0 }
 0xc77   : > { %1037 = vst.msk [vmem:[%s1641_s8 + $0x8] sm:$0xff] %vm1035_vm5, %v1313_v42  ;;  %v1025_v43 = vpop.f32.mrb[5].mxu0 }
 0xc78   : > { %1036 = vst.msk [vmem:[%s1641_s8] sm:$0xff] %vm1035_vm5, %v1025_v43 }
 0xc7a   : > { %v1320_v44 = vpop.f32.mrb[6].mxu0 }
 0xc7b   : > { %1117 = vst.msk [vmem:[%s1642_s9 + $0x8] sm:$0xff] %vm1035_vm5, %v1320_v44  ;;  %v1106_v45 = vpop.f32.mrb[7].mxu0 }
 0xc7c   : > { %1116 = vst.msk [vmem:[%s1642_s9] sm:$0xff] %vm1035_vm5, %v1106_v45 }
 0xc7d PF: > { %s20_s11 = sadd.s32 1, %s1423_s11   ;;  %s1643_s30 = smov %s1419_s10 }
 0xc7e   : > { %p17_p10 = scmp.ge.s32.totalorder %s20_s11, 8   ;;  %s1644_s10 = smov %s1646_s12 }
 0xc80   :  { %19 = sbr.rel (!%p17_p10) target bundleno = 2 (0x2), region = 118 }

</bundles_post_ra>
